<compile_context>
chip_gen: v7x
topology: tpu7x:2x2x1
jax: 0.10.0
libtpu: 0.0.40
codegen_flags: <defaults>
</compile_context>

<pallas_src>
import jax
import jax.numpy as jnp
from jax.experimental import pallas as pl
from jax.experimental.pallas import tpu as pltpu

BN_EPS = 1e-5          # nn.BatchNorm1d default
LANE = 128             # TPU vreg lane width
SUBLANE = 8


def _round_up(x, m):
    return (x + m - 1) // m * m


def _build_kernel(n_layers, batch, batch_pad, bn_eps):
    """Build the fused gather + MLP-tower kernel (layer count is static)."""

    def bn_relu(y, gamma, beta):
        # Train-mode BatchNorm1d with biased batch statistics, computed from
        # sum / sum-of-squares so zero padding rows contribute nothing.
        inv_n = 1.0 / batch
        mean = jnp.sum(y, axis=0, keepdims=True) * inv_n
        var = jnp.sum(y * y, axis=0, keepdims=True) * inv_n - mean * mean
        var = jnp.maximum(var, 0.0)
        scale = gamma * jax.lax.rsqrt(var + bn_eps)   # gamma folded into scale
        shift = beta - mean * scale
        return jnp.maximum(y * scale + shift, 0.0)

    def mask_pad_rows(x):
        if batch_pad == batch:
            return x
        rid = jax.lax.broadcasted_iota(jnp.int32, x.shape, 0)
        return jnp.where(rid < batch, x, 0.0)

    def kernel(users_ref, items_ref,            # scalar-prefetch (SMEM)
               uemb_hbm, iemb_hbm,              # embedding tables (HBM, ANY)
               *args):
        n_w = 4 + 3 * (n_layers - 1)            # wu0, wi0, g0, b0, (w,g,b)*rest
        w_refs = args[:n_w]
        o_ref = args[n_w]
        u_buf, i_buf, sem = args[n_w + 1:]

        # ---- fused embedding gather: one row-DMA per (user, item) ----------
        @pl.loop(0, batch)
        def _issue(b):
            pltpu.make_async_copy(uemb_hbm.at[users_ref[b]], u_buf.at[b],
                                  sem.at[0]).start()
            pltpu.make_async_copy(iemb_hbm.at[items_ref[b]], i_buf.at[b],
                                  sem.at[1]).start()

        @pl.loop(0, batch)
        def _drain(b):
            pltpu.make_async_copy(uemb_hbm.at[0], u_buf.at[0], sem.at[0]).wait()
            pltpu.make_async_copy(iemb_hbm.at[0], i_buf.at[0], sem.at[1]).wait()

        u = mask_pad_rows(u_buf[...])           # (B_pad, E) f32
        it = mask_pad_rows(i_buf[...])          # (B_pad, E) f32

        # ---- layer 0: concat(u, item) @ W0 done as two half matmuls --------
        wu, wi = w_refs[0][...], w_refs[1][...]          # bf16 (E, H1p)
        g0, b0 = w_refs[2][...], w_refs[3][...]          # f32  (1, H1p)
        y = jnp.dot(u.astype(jnp.bfloat16), wu,
                    preferred_element_type=jnp.float32)
        y = y + jnp.dot(it.astype(jnp.bfloat16), wi,
                        preferred_element_type=jnp.float32)
        h = mask_pad_rows(bn_relu(y, g0, b0))

        # ---- remaining layers: activations stay on-chip --------------------
        idx = 4
        for _ in range(1, n_layers):
            w = w_refs[idx][...]                          # bf16 (Dp_in, Dp_out)
            g, be = w_refs[idx + 1][...], w_refs[idx + 2][...]
            idx += 3
            y = jnp.dot(h.astype(jnp.bfloat16), w,
                        preferred_element_type=jnp.float32)
            h = mask_pad_rows(bn_relu(y, g, be))

        o_ref[...] = h                                    # lane-dense store

    return kernel


def pack_params(params, layers):
    """Pad feature dims to 128 lanes, cast weights to bf16, zero-pad gamma/beta.

    The Linear bias is dropped on purpose: train-mode BN subtracts the batch
    mean, which cancels any constant bias exactly.
    """
    emb = layers[0] // 2
    dims_pad = [_round_up(d, LANE) for d in layers]
    flat = []
    for l, (w, _b, gamma, beta) in enumerate(params["mlp_layers"]):
        din, dout = int(w.shape[0]), int(w.shape[1])
        dout_p = dims_pad[l + 1]
        g_p = jnp.zeros((1, dout_p), jnp.float32).at[0, :dout].set(gamma)
        be_p = jnp.zeros((1, dout_p), jnp.float32).at[0, :dout].set(beta)
        if l == 0:
            wu = jnp.zeros((emb, dout_p), jnp.float32).at[:, :dout].set(w[:emb])
            wi = jnp.zeros((emb, dout_p), jnp.float32).at[:, :dout].set(w[emb:])
            flat += [wu.astype(jnp.bfloat16), wi.astype(jnp.bfloat16), g_p, be_p]
        else:
            din_p = dims_pad[l]
            w_p = jnp.zeros((din_p, dout_p), jnp.float32).at[:din, :dout].set(w)
            flat += [w_p.astype(jnp.bfloat16), g_p, be_p]
    return flat, dims_pad


def mlp_forward(users, items, params, layers):
    """Pallas equivalent of MLP.forward(users, items) (train-mode BN)."""
    user_emb = params["user_embedding"]
    item_emb = params["item_embedding"]
    emb = int(user_emb.shape[1])
    batch = int(users.shape[0])
    batch_pad = _round_up(batch, SUBLANE)
    n_layers = len(layers) - 1

    flat_w, dims_pad = pack_params(params, layers)
    out_dim, out_dim_pad = layers[-1], dims_pad[-1]

    kernel = _build_kernel(n_layers, batch, batch_pad, BN_EPS)

    vmem_spec = pl.BlockSpec(memory_space=pltpu.MemorySpace.VMEM)
    any_spec = pl.BlockSpec(memory_space=pl.ANY)

    flops = 2 * batch * sum(a * b for a, b in zip(layers[:-1], layers[1:]))
    bytes_accessed = (batch * 2 * emb * 4
                      + sum(int(x.size) * x.dtype.itemsize for x in flat_w)
                      + batch_pad * out_dim_pad * 4)
    cost = pl.CostEstimate(flops=flops,
                           transcendentals=sum(layers[1:]),
                           bytes_accessed=bytes_accessed)

    grid_spec = pltpu.PrefetchScalarGridSpec(
        num_scalar_prefetch=2,                    # users, items -> SMEM
        grid=(),                                  # single invocation, no grid loop
        in_specs=[any_spec, any_spec] + [vmem_spec] * len(flat_w),
        out_specs=vmem_spec,
        scratch_shapes=[
            pltpu.VMEM((batch_pad, emb), jnp.float32),   # gathered user rows
            pltpu.VMEM((batch_pad, emb), jnp.float32),   # gathered item rows
            pltpu.SemaphoreType.DMA((2,)),               # user / item gather sems
        ],
    )

    out = pl.pallas_call(
        kernel,
        out_shape=jax.ShapeDtypeStruct((batch_pad, out_dim_pad), jnp.float32),
        grid_spec=grid_spec,
        compiler_params=pltpu.CompilerParams(vmem_limit_bytes=32 * 1024 * 1024),
        cost_estimate=cost,
    )(users.astype(jnp.int32), items.astype(jnp.int32),
      user_emb, item_emb, *flat_w)

    return out[:batch, :out_dim]


def mlp_forward_reference(users, items, params):
    """Pure-JAX f32 reference (includes the Linear bias, which BN cancels)."""
    x = jnp.concatenate([params["user_embedding"][users],
                         params["item_embedding"][items]], axis=-1)
    for (w, b, gamma, beta) in params["mlp_layers"]:
        y = x @ w + b
        mean = jnp.mean(y, axis=0, keepdims=True)
        var = jnp.mean((y - mean) ** 2, axis=0, keepdims=True)
        x = jnp.maximum((y - mean) * jax.lax.rsqrt(var + BN_EPS) * gamma + beta, 0.0)
    return x


def init_params(key, user_no, item_no, embedding_size, layers):
    keys = jax.random.split(key, 2 + 2 * (len(layers) - 1))
    params = {
        "user_embedding": jax.random.normal(keys[0], (user_no, embedding_size), jnp.float32),
        "item_embedding": jax.random.normal(keys[1], (item_no, embedding_size), jnp.float32),
        "mlp_layers": [],
    }
    kidx = 2
    for in_size, out_size in zip(layers[:-1], layers[1:]):
        bound = 1.0 / (in_size ** 0.5)
        w = jax.random.uniform(keys[kidx], (in_size, out_size), jnp.float32, -bound, bound)
        b = jax.random.uniform(keys[kidx + 1], (out_size,), jnp.float32, -bound, bound)
        gamma = jnp.ones((out_size,), jnp.float32)
        beta = jnp.zeros((out_size,), jnp.float32)
        params["mlp_layers"].append((w, b, gamma, beta))
        kidx += 2
    return params


if __name__ == "__main__":
    user_no, item_no, embedding_size = 100, 200, 32
    layers = [2 * embedding_size, 32, 16]   # layers[0] == 2 * embedding_size
    batch = 8

    key = jax.random.PRNGKey(0)
    pkey, ukey, ikey = jax.random.split(key, 3)
    params = init_params(pkey, user_no, item_no, embedding_size, layers)
    users = jax.random.randint(ukey, (batch,), 0, user_no, dtype=jnp.int32)
    items = jax.random.randint(ikey, (batch,), 0, item_no, dtype=jnp.int32)

    out = mlp_forward(users, items, params, layers)
    out = jax.block_until_ready(out)
    assert out.shape == (batch, layers[-1])
    assert bool(jnp.all(jnp.isfinite(out)))

    ref = mlp_forward_reference(users, items, params)
    max_diff = float(jnp.max(jnp.abs(out - ref)))
    assert max_diff < 0.2, f"mismatch vs f32 reference: {max_diff}"

    print("KERNEL_OK")
</pallas_src>

<mosaic_0001>
module attributes {stable_mosaic.version = 11 : i64} {
  func.func @kernel(%arg0: memref<8xi32, #tpu.memory_space<smem>>, %arg1: memref<8xi32, #tpu.memory_space<smem>>, %arg2: memref<100x32xf32, #tpu.memory_space<any>>, %arg3: memref<200x32xf32, #tpu.memory_space<any>>, %arg4: memref<32x128xbf16, #tpu.memory_space<vmem>>, %arg5: memref<32x128xbf16, #tpu.memory_space<vmem>>, %arg6: memref<1x128xf32, #tpu.memory_space<vmem>>, %arg7: memref<1x128xf32, #tpu.memory_space<vmem>>, %arg8: memref<128x128xbf16, #tpu.memory_space<vmem>>, %arg9: memref<1x128xf32, #tpu.memory_space<vmem>>, %arg10: memref<1x128xf32, #tpu.memory_space<vmem>>, %arg11: memref<8x128xf32, #tpu.memory_space<vmem>>, %arg12: memref<8x32xf32, #tpu.memory_space<vmem>>, %arg13: memref<8x32xf32, #tpu.memory_space<vmem>>, %arg14: memref<2x!tpu.dma_semaphore, #tpu.memory_space<semaphore_mem>>) attributes {dimension_semantics = [], scalar_prefetch = 2 : i64, scratch_operands = 3 : i64, tpu.core_type = #tpu.core_type<tc>} {
    %c0_i32 = arith.constant 0 : i32
    %c8_i32 = arith.constant 8 : i32
    %0 = arith.addi %c0_i32, %c8_i32 : i32
    %c1_i32 = arith.constant 1 : i32
    scf.for %arg15 = %c0_i32 to %0 step %c1_i32  : i32 {
      %c1_i32_39 = arith.constant 1 : i32
      %69 = arith.muli %arg15, %c1_i32_39 : i32
      %c0_i32_40 = arith.constant 0 : i32
      %70 = arith.addi %c0_i32_40, %69 : i32
      %71 = arith.index_cast %70 : i32 to index
      %72 = memref.load %arg0[%71] : memref<8xi32, #tpu.memory_space<smem>>
      %c0_i32_41 = arith.constant 0 : i32
      %c0_i32_42 = arith.constant 0 : i32
      %73 = tpu.memref_slice %arg2[%72, %c0_i32_42] : memref<100x32xf32, #tpu.memory_space<any>> -> memref<1x32xf32, #tpu.memory_space<any>>
      %74 = tpu.memref_squeeze %73 : memref<1x32xf32, #tpu.memory_space<any>> -> memref<32xf32, #tpu.memory_space<any>>
      %c0_i32_43 = arith.constant 0 : i32
      %75 = tpu.memref_slice %arg12[%70, %c0_i32_43] : memref<8x32xf32, #tpu.memory_space<vmem>> -> memref<1x32xf32, #tpu.memory_space<vmem>>
      %76 = tpu.memref_squeeze %75 : memref<1x32xf32, #tpu.memory_space<vmem>> -> memref<32xf32, #tpu.memory_space<vmem>>
      %77 = tpu.memref_slice %arg14[%c0_i32_41] : memref<2x!tpu.dma_semaphore, #tpu.memory_space<semaphore_mem>> -> memref<1x!tpu.dma_semaphore, #tpu.memory_space<semaphore_mem>>
      %78 = tpu.memref_squeeze %77 : memref<1x!tpu.dma_semaphore, #tpu.memory_space<semaphore_mem>> -> memref<!tpu.dma_semaphore, #tpu.memory_space<semaphore_mem>>
      tpu.enqueue_dma source(%74 : memref<32xf32, #tpu.memory_space<any>>) target(%76 : memref<32xf32, #tpu.memory_space<vmem>>) target_semaphore(%78 : memref<!tpu.dma_semaphore, #tpu.memory_space<semaphore_mem>>)
      %79 = arith.index_cast %70 : i32 to index
      %80 = memref.load %arg1[%79] : memref<8xi32, #tpu.memory_space<smem>>
      %c1_i32_44 = arith.constant 1 : i32
      %c0_i32_45 = arith.constant 0 : i32
      %81 = tpu.memref_slice %arg3[%80, %c0_i32_45] : memref<200x32xf32, #tpu.memory_space<any>> -> memref<1x32xf32, #tpu.memory_space<any>>
      %82 = tpu.memref_squeeze %81 : memref<1x32xf32, #tpu.memory_space<any>> -> memref<32xf32, #tpu.memory_space<any>>
      %c0_i32_46 = arith.constant 0 : i32
      %83 = tpu.memref_slice %arg13[%70, %c0_i32_46] : memref<8x32xf32, #tpu.memory_space<vmem>> -> memref<1x32xf32, #tpu.memory_space<vmem>>
      %84 = tpu.memref_squeeze %83 : memref<1x32xf32, #tpu.memory_space<vmem>> -> memref<32xf32, #tpu.memory_space<vmem>>
      %85 = tpu.memref_slice %arg14[%c1_i32_44] : memref<2x!tpu.dma_semaphore, #tpu.memory_space<semaphore_mem>> -> memref<1x!tpu.dma_semaphore, #tpu.memory_space<semaphore_mem>>
      %86 = tpu.memref_squeeze %85 : memref<1x!tpu.dma_semaphore, #tpu.memory_space<semaphore_mem>> -> memref<!tpu.dma_semaphore, #tpu.memory_space<semaphore_mem>>
      tpu.enqueue_dma source(%82 : memref<32xf32, #tpu.memory_space<any>>) target(%84 : memref<32xf32, #tpu.memory_space<vmem>>) target_semaphore(%86 : memref<!tpu.dma_semaphore, #tpu.memory_space<semaphore_mem>>)
    }
    %c8_i32_0 = arith.constant 8 : i32
    %c0_i32_1 = arith.constant 0 : i32
    %c8_i32_2 = arith.constant 8 : i32
    %1 = arith.addi %c0_i32_1, %c8_i32_2 : i32
    %c1_i32_3 = arith.constant 1 : i32
    scf.for %arg15 = %c0_i32_1 to %1 step %c1_i32_3  : i32 {
      %c0_i32_39 = arith.constant 0 : i32
      %c0_i32_40 = arith.constant 0 : i32
      %c0_i32_41 = arith.constant 0 : i32
      %c0_i32_42 = arith.constant 0 : i32
      %69 = tpu.memref_slice %arg2[%c0_i32_39, %c0_i32_42] : memref<100x32xf32, #tpu.memory_space<any>> -> memref<1x32xf32, #tpu.memory_space<any>>
      %70 = tpu.memref_squeeze %69 : memref<1x32xf32, #tpu.memory_space<any>> -> memref<32xf32, #tpu.memory_space<any>>
      %c0_i32_43 = arith.constant 0 : i32
      %71 = tpu.memref_slice %arg12[%c0_i32_40, %c0_i32_43] : memref<8x32xf32, #tpu.memory_space<vmem>> -> memref<1x32xf32, #tpu.memory_space<vmem>>
      %72 = tpu.memref_squeeze %71 : memref<1x32xf32, #tpu.memory_space<vmem>> -> memref<32xf32, #tpu.memory_space<vmem>>
      %73 = tpu.memref_slice %arg14[%c0_i32_41] : memref<2x!tpu.dma_semaphore, #tpu.memory_space<semaphore_mem>> -> memref<1x!tpu.dma_semaphore, #tpu.memory_space<semaphore_mem>>
      %74 = tpu.memref_squeeze %73 : memref<1x!tpu.dma_semaphore, #tpu.memory_space<semaphore_mem>> -> memref<!tpu.dma_semaphore, #tpu.memory_space<semaphore_mem>>
      tpu.wait_dma2 semaphore(%74 : memref<!tpu.dma_semaphore, #tpu.memory_space<semaphore_mem>>) src(%70 : memref<32xf32, #tpu.memory_space<any>>) dst(%72 : memref<32xf32, #tpu.memory_space<vmem>>)
      %c0_i32_44 = arith.constant 0 : i32
      %c0_i32_45 = arith.constant 0 : i32
      %c1_i32_46 = arith.constant 1 : i32
      %c0_i32_47 = arith.constant 0 : i32
      %75 = tpu.memref_slice %arg3[%c0_i32_44, %c0_i32_47] : memref<200x32xf32, #tpu.memory_space<any>> -> memref<1x32xf32, #tpu.memory_space<any>>
      %76 = tpu.memref_squeeze %75 : memref<1x32xf32, #tpu.memory_space<any>> -> memref<32xf32, #tpu.memory_space<any>>
      %c0_i32_48 = arith.constant 0 : i32
      %77 = tpu.memref_slice %arg13[%c0_i32_45, %c0_i32_48] : memref<8x32xf32, #tpu.memory_space<vmem>> -> memref<1x32xf32, #tpu.memory_space<vmem>>
      %78 = tpu.memref_squeeze %77 : memref<1x32xf32, #tpu.memory_space<vmem>> -> memref<32xf32, #tpu.memory_space<vmem>>
      %79 = tpu.memref_slice %arg14[%c1_i32_46] : memref<2x!tpu.dma_semaphore, #tpu.memory_space<semaphore_mem>> -> memref<1x!tpu.dma_semaphore, #tpu.memory_space<semaphore_mem>>
      %80 = tpu.memref_squeeze %79 : memref<1x!tpu.dma_semaphore, #tpu.memory_space<semaphore_mem>> -> memref<!tpu.dma_semaphore, #tpu.memory_space<semaphore_mem>>
      tpu.wait_dma2 semaphore(%80 : memref<!tpu.dma_semaphore, #tpu.memory_space<semaphore_mem>>) src(%76 : memref<32xf32, #tpu.memory_space<any>>) dst(%78 : memref<32xf32, #tpu.memory_space<vmem>>)
    }
    %c0 = arith.constant 0 : index
    %c0_4 = arith.constant 0 : index
    %2 = vector.load %arg12[%c0, %c0_4] : memref<8x32xf32, #tpu.memory_space<vmem>>, vector<8x32xf32>
    %c0_5 = arith.constant 0 : index
    %c0_6 = arith.constant 0 : index
    %3 = vector.load %arg13[%c0_5, %c0_6] : memref<8x32xf32, #tpu.memory_space<vmem>>, vector<8x32xf32>
    %c0_7 = arith.constant 0 : index
    %c0_8 = arith.constant 0 : index
    %4 = vector.load %arg4[%c0_7, %c0_8] : memref<32x128xbf16, #tpu.memory_space<vmem>>, vector<32x128xbf16>
    %c0_9 = arith.constant 0 : index
    %c0_10 = arith.constant 0 : index
    %5 = vector.load %arg5[%c0_9, %c0_10] : memref<32x128xbf16, #tpu.memory_space<vmem>>, vector<32x128xbf16>
    %c0_11 = arith.constant 0 : index
    %c0_12 = arith.constant 0 : index
    %6 = vector.load %arg6[%c0_11, %c0_12] : memref<1x128xf32, #tpu.memory_space<vmem>>, vector<1x128xf32>
    %c0_13 = arith.constant 0 : index
    %c0_14 = arith.constant 0 : index
    %7 = vector.load %arg7[%c0_13, %c0_14] : memref<1x128xf32, #tpu.memory_space<vmem>>, vector<1x128xf32>
    %8 = arith.truncf %2 : vector<8x32xf32> to vector<8x32xbf16>
    %cst = arith.constant dense<0.000000e+00> : vector<8x128xf32>
    %9 = tpu.matmul %8, %4, %cst {dimension_numbers = #tpu.dot_dimension_numbers<[1], [0], [0], [1], [0, 0, 1, 1], [], []>} : vector<8x32xbf16>, vector<32x128xbf16>, vector<8x128xf32> -> vector<8x128xf32>
    %10 = arith.truncf %3 : vector<8x32xf32> to vector<8x32xbf16>
    %cst_15 = arith.constant dense<0.000000e+00> : vector<8x128xf32>
    %11 = tpu.matmul %10, %5, %cst_15 {dimension_numbers = #tpu.dot_dimension_numbers<[1], [0], [0], [1], [0, 0, 1, 1], [], []>} : vector<8x32xbf16>, vector<32x128xbf16>, vector<8x128xf32> -> vector<8x128xf32>
    %12 = arith.addf %9, %11 : vector<8x128xf32>
    %cst_16 = arith.constant dense<0.000000e+00> : vector<128xf32>
    %13 = vector.multi_reduction <add>, %12, %cst_16 [0] : vector<8x128xf32> to vector<128xf32>
    %14 = vector.shape_cast %13 : vector<128xf32> to vector<1x128xf32>
    %cst_17 = arith.constant 1.250000e-01 : f32
    %15 = vector.broadcast %cst_17 : f32 to vector<1x128xf32>
    %16 = arith.mulf %14, %15 : vector<1x128xf32>
    %17 = arith.mulf %12, %12 : vector<8x128xf32>
    %cst_18 = arith.constant dense<0.000000e+00> : vector<128xf32>
    %18 = vector.multi_reduction <add>, %17, %cst_18 [0] : vector<8x128xf32> to vector<128xf32>
    %19 = vector.shape_cast %18 : vector<128xf32> to vector<1x128xf32>
    %cst_19 = arith.constant 1.250000e-01 : f32
    %20 = vector.broadcast %cst_19 : f32 to vector<1x128xf32>
    %21 = arith.mulf %19, %20 : vector<1x128xf32>
    %22 = arith.mulf %16, %16 : vector<1x128xf32>
    %23 = arith.subf %21, %22 : vector<1x128xf32>
    %cst_20 = arith.constant 0.000000e+00 : f32
    %24 = vector.broadcast %cst_20 : f32 to vector<1x128xf32>
    %25 = arith.maximumf %23, %24 : vector<1x128xf32>
    %cst_21 = arith.constant 9.99999974E-6 : f32
    %26 = vector.broadcast %cst_21 : f32 to vector<1x128xf32>
    %27 = arith.addf %25, %26 : vector<1x128xf32>
    %28 = math.rsqrt %27 : vector<1x128xf32>
    %29 = arith.mulf %6, %28 : vector<1x128xf32>
    %30 = arith.mulf %16, %29 : vector<1x128xf32>
    %31 = arith.subf %7, %30 : vector<1x128xf32>
    %32 = vector.broadcast %29 : vector<1x128xf32> to vector<8x128xf32>
    %33 = arith.mulf %12, %32 : vector<8x128xf32>
    %34 = vector.broadcast %31 : vector<1x128xf32> to vector<8x128xf32>
    %35 = arith.addf %33, %34 : vector<8x128xf32>
    %cst_22 = arith.constant 0.000000e+00 : f32
    %36 = vector.broadcast %cst_22 : f32 to vector<8x128xf32>
    %37 = arith.maximumf %35, %36 : vector<8x128xf32>
    %c0_23 = arith.constant 0 : index
    %c0_24 = arith.constant 0 : index
    %38 = vector.load %arg8[%c0_23, %c0_24] : memref<128x128xbf16, #tpu.memory_space<vmem>>, vector<128x128xbf16>
    %c0_25 = arith.constant 0 : index
    %c0_26 = arith.constant 0 : index
    %39 = vector.load %arg9[%c0_25, %c0_26] : memref<1x128xf32, #tpu.memory_space<vmem>>, vector<1x128xf32>
    %c0_27 = arith.constant 0 : index
    %c0_28 = arith.constant 0 : index
    %40 = vector.load %arg10[%c0_27, %c0_28] : memref<1x128xf32, #tpu.memory_space<vmem>>, vector<1x128xf32>
    %41 = arith.truncf %37 : vector<8x128xf32> to vector<8x128xbf16>
    %cst_29 = arith.constant dense<0.000000e+00> : vector<8x128xf32>
    %42 = tpu.matmul %41, %38, %cst_29 {dimension_numbers = #tpu.dot_dimension_numbers<[1], [0], [0], [1], [0, 0, 1, 1], [], []>} : vector<8x128xbf16>, vector<128x128xbf16>, vector<8x128xf32> -> vector<8x128xf32>
    %cst_30 = arith.constant dense<0.000000e+00> : vector<128xf32>
    %43 = vector.multi_reduction <add>, %42, %cst_30 [0] : vector<8x128xf32> to vector<128xf32>
    %44 = vector.shape_cast %43 : vector<128xf32> to vector<1x128xf32>
    %cst_31 = arith.constant 1.250000e-01 : f32
    %45 = vector.broadcast %cst_31 : f32 to vector<1x128xf32>
    %46 = arith.mulf %44, %45 : vector<1x128xf32>
    %47 = arith.mulf %42, %42 : vector<8x128xf32>
    %cst_32 = arith.constant dense<0.000000e+00> : vector<128xf32>
    %48 = vector.multi_reduction <add>, %47, %cst_32 [0] : vector<8x128xf32> to vector<128xf32>
    %49 = vector.shape_cast %48 : vector<128xf32> to vector<1x128xf32>
    %cst_33 = arith.constant 1.250000e-01 : f32
    %50 = vector.broadcast %cst_33 : f32 to vector<1x128xf32>
    %51 = arith.mulf %49, %50 : vector<1x128xf32>
    %52 = arith.mulf %46, %46 : vector<1x128xf32>
    %53 = arith.subf %51, %52 : vector<1x128xf32>
    %cst_34 = arith.constant 0.000000e+00 : f32
    %54 = vector.broadcast %cst_34 : f32 to vector<1x128xf32>
    %55 = arith.maximumf %53, %54 : vector<1x128xf32>
    %cst_35 = arith.constant 9.99999974E-6 : f32
    %56 = vector.broadcast %cst_35 : f32 to vector<1x128xf32>
    %57 = arith.addf %55, %56 : vector<1x128xf32>
    %58 = math.rsqrt %57 : vector<1x128xf32>
    %59 = arith.mulf %39, %58 : vector<1x128xf32>
    %60 = arith.mulf %46, %59 : vector<1x128xf32>
    %61 = arith.subf %40, %60 : vector<1x128xf32>
    %62 = vector.broadcast %59 : vector<1x128xf32> to vector<8x128xf32>
    %63 = arith.mulf %42, %62 : vector<8x128xf32>
    %64 = vector.broadcast %61 : vector<1x128xf32> to vector<8x128xf32>
    %65 = arith.addf %63, %64 : vector<8x128xf32>
    %cst_36 = arith.constant 0.000000e+00 : f32
    %66 = vector.broadcast %cst_36 : f32 to vector<8x128xf32>
    %67 = arith.maximumf %65, %66 : vector<8x128xf32>
    %c0_37 = arith.constant 0 : index
    %c0_38 = arith.constant 0 : index
    %68 = vector.load %arg11[%c0_37, %c0_38] : memref<8x128xf32, #tpu.memory_space<vmem>>, vector<8x128xf32>
    tpu.vector_store %arg11[%c0_37, %c0_38], %67 {strides = array<i32>} : memref<8x128xf32, #tpu.memory_space<vmem>>, vector<8x128xf32>,
    return
  }
}

</mosaic_0001>

<bundles_post_ra>
// kernel: tpu_custom_call.1
= control target key start
LH: loop header
LB: loop body
LE: loop exit
PB: predicated region body
PF: predicated region fallthrough
CT: control target
= control target key end

     0   :  { %s839_s0 = inlined_call_operand.vmem [shape: s32[8], index: 0, kind: input, shape index: {}]   ;;  %s840_s2 = inlined_call_operand.vmem [shape: f32[100,32], index: 2, kind: input, shape index: {}]   ;;  %s841_s3 = inlined_call_operand.vmem [shape: f32[200,32], index: 3, kind: input, shape index: {}]   ;;  %s842_s4 = inlined_call_operand.vmem [shape: bf16[32,128], index: 4, kind: input, shape index: {}]   ;;  %s843_s5 = inlined_call_operand.vmem [shape: bf16[32,128], index: 5, kind: input, shape index: {}]   ;;  %s844_s6 = inlined_call_operand.vmem [shape: f32[1,128], index: 6, kind: input, shape index: {}]   ;;  %s845_s7 = inlined_call_operand.vmem [shape: f32[1,128], index: 7, kind: input, shape index: {}]   ;;  %s846_s8 = inlined_call_operand.vmem [shape: bf16[128,128], index: 8, kind: input, shape index: {}]   ;;  %s847_s9 = inlined_call_operand.vmem [shape: f32[1,128], index: 9, kind: input, shape index: {}]   ;;  %s848_s10 = inlined_call_operand.vmem [shape: f32[1,128], index: 10, kind: input, shape index: {}]   ;;  %s849_s11 = inlined_call_operand.hbm [shape: f32[8,128], index: 11, kind: output, shape index: {}]   ;;  %s850_s1 = inlined_call_operand.vmem [shape: s32[8], index: 1, kind: input, shape index: {}]  }
   0x1   :  { %s16_s19 = sshll.u32 %s839_s0, 4  ;;  %s20_s22 = sshll.u32 %s850_s1, 4  ;;  %s17_s19 = int_to_ptr.vmem [resolvable:$true] %s16_s19  ;;  %s21_s22 = int_to_ptr.vmem [resolvable:$true] %s20_s22 }
   0x2   :  { %s632_s23 = scalar_lea.vmem %s17_s19, 16  ;;  %p637_p1 = scmp.lt.s32.totalorder %s17_s19, %s17_s19 }
   0x3   :  { %p633_p0 = scmp.ne.s32.totalorder %s17_s19, %s632_s23  ;;  %p638_p2 = scmp.lt.s32.totalorder %s632_s23, %s632_s23 }
   0x5   :  { %p639_p3 = por %p638_p2, %p637_p1 }
   0x7   :  { %p640_p4 = pnand %p639_p3, %p633_p0 }
   0x9   :  { %643 = shalt.err (!%p640_p4)  }
   0xa   :  { %s702_s24 = smov [#allocation6]   ;;  %s644_s25 = scalar_lea.vmem %s21_s22, 16 }
   0xb   :  { %19 = dma.vmem_to_smem %s17_s19, 16, %s702_s24, [#allocation5] }
   0xc   :  { %p645_p5 = scmp.ne.s32.totalorder %s21_s22, %s644_s25  ;;  %p649_p6 = scmp.lt.s32.totalorder %s21_s22, %s21_s22 }
   0xd   :  { %p650_p7 = scmp.lt.s32.totalorder %s644_s25, %s644_s25 }
   0xf   :  { %p651_p8 = por %p650_p7, %p649_p6 }
  0x11   :  { %p652_p9 = pnand %p651_p8, %p645_p5 }
  0x13   :  { %655 = shalt.err (!%p652_p9)  }
  0x14   :  { %s703_s0 = smov [#allocation7]  }
  0x15   :  { %23 = dma.vmem_to_smem %s21_s22, 16, %s703_s0, [#allocation5] }
  0x16   :  { %686 = dma.done.wait [#allocation5], 32 }
  0x17   :  { %687 = vsyncadd [#allocation5], 4294967264 }
  0x18   :  { %25 = sfence }
  0x19   :  { %26 = vsyncpa [#allocation9], 0  ;;  %s694_s1 = smov 0  }
  0x1a LB: > { %s48_s26 = sld [smem:[#allocation6 + %s696_s1]]  ;;  %s50_s30 = scalar_lea.vmem [#allocation2], %s696_s1  ;;  %s696_s1 = sphi %s694_s1, %s47_s1  }
  0x20   : > { %s49_s29 = scalar_lea.vmem %s840_s2, %s48_s26 }
  0x21   : > { %v68_v0 = vld [vmem:[%s49_s29] sm:$0x1] }
  0x22   : > { %69 = vst [vmem:[%s50_s30] sm:$0x1] %v68_v0 }
  0x23   : > { %94 = vsyncadd [#allocation4], 16  ;;  %s95_s12 = sld [smem:[#allocation7 + %s696_s1]]  ;;  %s97_s16 = scalar_lea.vmem [#allocation3], %s696_s1 }
  0x29   : > { %s96_s15 = scalar_lea.vmem %s841_s3, %s95_s12 }
  0x2a   : > { %v116_v1 = vld [vmem:[%s96_s15] sm:$0x1] }
  0x2b   : > { %117 = vst [vmem:[%s97_s16] sm:$0x1] %v116_v1 }
  0x2c   : > { %142 = vsyncadd [#allocation4 + $0x1], 16  ;;  %s47_s1 = sadd.s32 1, %s696_s1  }
  0x2d   : > { %p44_p10 = scmp.ge.s32.totalorder %s47_s1, 8  }
  0x2e   :  { %s698_s17 = smov (%p44_p10), 0  }
  0x2f   :  { %46 = sbr.rel (!%p44_p10) target bundleno = 26 (0x1a), region = 149 }
  0x36 LB: > { %688 = dma.done.wait [#allocation4], 16  ;;  %s700_s17 = sphi %s698_s17, %s148_s17  }
  0x37   : > { %689 = vsyncadd [#allocation4], 4294967280 }
  0x38   : > { %690 = dma.done.wait [#allocation4 + $0x1], 16 }
  0x39   : > { %691 = vsyncadd [#allocation4 + $0x1], 4294967280  ;;  %s148_s17 = sadd.s32 1, %s700_s17  }
  0x3a   : > { %p145_p11 = scmp.ge.s32.totalorder %s148_s17, 8  }
  0x3b   :  { %v616_v2 = vld [vmem:[%s843_s5] sm:$0xff] (%p145_p11)   ;;  %v704_v3 = vmov (%p145_p11), 0.0   ;;  %v617_v4 = vld [vmem:[%s843_s5 + $0x8] sm:$0xff] (%p145_p11)   ;;  %vm705_vm0 = vmmov (%p145_p11), 0   ;;  %vm180_vm1 = vcmask (%p145_p11), 261120   ;;  %v622_v13 = vld [vmem:[%s846_s8 + $0x10] sm:$0xff] (%p145_p11)   ;;  %v303_v42 = vlaneseq (%p145_p11) }
  0x3c   :  { %147 = sbr.rel (!%p145_p11) target bundleno = 54 (0x36), region = 160  ;;  %555 = vmatprep.subr.bf16.mxu0 (%p145_p11), %v704_v3  ;;  %571 = vmatprep.subr.bf16.mxu1 (%p145_p11), %v704_v3  ;;  %v155_v5 = vld [vmem:[#allocation3] sm:$0xff] (%p145_p11)  ;;  %v618_v6 = vld [vmem:[%s842_s4] sm:$0xff] (%p145_p11)   ;;  %v623_v14 = vld [vmem:[%s846_s8 + $0x18] sm:$0xff] (%p145_p11)   ;;  %s706_s2 = smov (%p145_p11), [#allocation8]  }
  0x3d   :  { %556 = vmatpush3.bf16.msra.mxu0 (%p145_p11), %v616_v2  ;;  %559 = vmatprep.mubr.msk.bf16.mxu0 (%p145_p11), %vm705_vm0, %v704_v3  ;;  %v167_v7 = vpack.c.bf16 (%p145_p11), %v155_v5, %v155_v5  ;;  %v619_v8 = vld [vmem:[%s842_s4 + $0x8] sm:$0xff] (%p145_p11)   ;;  %v154_v9 = vld [vmem:[#allocation2] sm:$0xff] (%p145_p11)  ;;  %v626_v17 = vld [vmem:[%s846_s8 + $0x30] sm:$0xff] (%p145_p11)   ;;  %v304_v43 = vshrl.u32 (%p145_p11), %v303_v42, 7  ;;  %s469_s3 = sshll.u32 (%p145_p11), %s706_s2, 4  ;;  %s470_s3 = int_to_ptr.vmem [resolvable:$true] %s469_s3 }
  0x3e   :  { %557 = vmatprep.subr.bf16.mxu0 (%p145_p11), %v704_v3  ;;  %587 = vmatprep.mubr.msk.bf16.mxu1 (%p145_p11), %vm705_vm0, %v704_v3  ;;  %v166_v10 = vpack.c.bf16 (%p145_p11), %v154_v9, %v154_v9  ;;  %v620_v11 = vld [vmem:[%s846_s8] sm:$0xff] (%p145_p11)   ;;  %v621_v12 = vld [vmem:[%s846_s8 + $0x8] sm:$0xff] (%p145_p11)   ;;  %v627_v18 = vld [vmem:[%s846_s8 + $0x38] sm:$0xff] (%p145_p11)   ;;  %s656_s22 = scalar_lea.vmem (%p145_p11), %s470_s3, 128  ;;  %p661_p13 = scmp.lt.s32.totalorder (%p145_p11), %s470_s3, %s470_s3 }
  0x3f   :  { %572 = vmatpush3.bf16.msra.mxu1 (%p145_p11), %v620_v11  ;;  %v624_v15 = vld [vmem:[%s846_s8 + $0x20] sm:$0xff] (%p145_p11)   ;;  %v625_v16 = vld [vmem:[%s846_s8 + $0x28] sm:$0xff] (%p145_p11)   ;;  %v305_v45 = vsub.s32 (%p145_p11), 0, %v304_v43  ;;  %p657_p12 = scmp.ne.s32.totalorder (%p145_p11), %s470_s3, %s656_s22  ;;  %p662_p0 = scmp.lt.s32.totalorder (%p145_p11), %s656_s22, %s656_s22 }
  0x40   :  { %573 = vmatprep.subr.bf16.mxu1 (%p145_p11), %v704_v3  ;;  %v164_v44 = vld [vmem:[%s844_s6] sm:$0x1] (%p145_p11) }
  0x41   :  { %558 = vmatpush3.bf16.msra.mxu0 (%p145_p11), %v617_v4  ;;  %v165_v48 = vld [vmem:[%s845_s7] sm:$0x1] (%p145_p11)  ;;  %p663_p1 = por (%p145_p11), %p662_p0, %p661_p13 }
  0x42   :  { %563 = vmatprep.subr.bf16.mxu0 (%p145_p11), %v704_v3 }
  0x43   :  { %574 = vmatpush3.bf16.msra.mxu1 %v621_v12  ;;  %p664_p2 = pnand %p663_p1, %p657_p12 }
  0x44   :  { %560 = vmatmul.mubr.msk.bf16.vlgmr.msra.gmra.mrb[0].mxu0 %vm180_vm1, %v167_v7  ;;  %575 = vmatprep.subr.bf16.mxu1 %v704_v3 }
  0x45   :  { %564 = vmatpush3.bf16.msra.mxu0 %v618_v6  ;;  %567 = vmatprep.mubr.msk.bf16.mxu0 %vm705_vm0, %v704_v3 }
  0x46   :  { %565 = vmatprep.subr.bf16.mxu0 %v704_v3 }
  0x47   :  { %576 = vmatpush3.bf16.msra.mxu1 %v622_v13 }
  0x48   :  { %577 = vmatprep.subr.bf16.mxu1 %v704_v3 }
  0x49   :  { %566 = vmatpush3.bf16.msra.mxu0 %v619_v8 }
  0x4b   :  { %578 = vmatpush3.bf16.msra.mxu1 %v623_v14 }
  0x4c   :  { %579 = vmatprep.subr.bf16.mxu1 %v704_v3 }
  0x4f   :  { %580 = vmatpush3.bf16.msra.mxu1 %v624_v15 }
  0x50   :  { %568 = vmatmul.mubr.msk.bf16.vlgmr.msra.gmra.mrb[0].mxu0 %vm180_vm1, %v166_v10  ;;  %581 = vmatprep.subr.bf16.mxu1 %v704_v3 }
  0x53   :  { %582 = vmatpush3.bf16.msra.mxu1 %v625_v16  ;;  %v333_v16 = vld [vmem:[%s847_s9] sm:$0x1] }
  0x54   :  { %583 = vmatprep.subr.bf16.mxu1 %v704_v3 }
  0x57   :  { %584 = vmatpush3.bf16.msra.mxu1 %v626_v17 }
  0x58   :  { %585 = vmatprep.subr.bf16.mxu1 %v704_v3 }
  0x5b   :  { %586 = vmatpush3.bf16.msra.mxu1 %v627_v18 }
 0x123   :  { %v273_v19 = vpop.f32.mrb[0].mxu0 }
 0x124   :  { %v279_v20 = vrot.slane %v273_v19, 4  ;;  %v286_v21 = vmul.f32 %v273_v19, %v273_v19  ;;  %v569_v22 = vpop.f32.mrb[1].mxu0 }
 0x125   :  { %v276_v23 = vpop.f32.mrb[2].mxu0 }
 0x126   :  { %v280_v24 = vadd.f32 %v279_v20, %v273_v19  ;;  %v287_v25 = vrot.slane %v286_v21, 4  ;;  %v570_v26 = vpop.f32.mrb[3].mxu0 }
 0x128   :  { %v281_v27 = vrot.slane %v280_v24, 2  ;;  %v288_v28 = vadd.f32 %v287_v25, %v286_v21 }
 0x12a   :  { %v282_v29 = vadd.f32 %v281_v27, %v280_v24  ;;  %v289_v30 = vrot.slane %v288_v28, 2 }
 0x12c   :  { %v283_v31 = vrot.slane %v282_v29, 1  ;;  %v290_v32 = vadd.f32 %v289_v30, %v288_v28 }
 0x12e   :  { %v284_v33 = vadd.f32 %v283_v31, %v282_v29  ;;  %v291_v34 = vrot.slane %v290_v32, 1 }
 0x130   :  { %v285_v35 = vmul.f32 0.125, %v284_v33  ;;  %v292_v36 = vadd.f32 %v291_v34, %v290_v32 }
 0x132   :  { %v293_v37 = vmul.f32 0.125, %v292_v36  ;;  %v294_v38 = vmul.f32 %v285_v35, %v285_v35 }
 0x134   :  { %v295_v39 = vsub.f32 %v293_v37, %v294_v38 }
 0x136   :  { %v296_v40 = vmax.f32 %v295_v39, 0.0 }
 0x138   :  { %v297_v41 = vadd.f32 1e-05, %v296_v40 }
 0x13a   :  { %628 = vrsqrt.f32 %v297_v41 }
 0x144   :  { %v629_v46 = vpop.eup %628 }
 0x145   :  { %v299_v47 = vmul.f32 %v629_v46, %v164_v44 }
 0x147   :  { %v306_v49 = vrot.slane %v299_v47, %v305_v45  ;;  %v300_v50 = vmul.f32 %v299_v47, %v285_v35 }
 0x149   :  { %v301_v51 = vsub.f32 %v165_v48, %v300_v50  ;;  %v308_v52 = vmul.f32 %v306_v49, %v273_v19  ;;  %v334_v19 = vld [vmem:[%s848_s10] sm:$0x1] }
 0x14b   :  { %v313_v53 = vrot.slane %v301_v51, %v305_v45 }
 0x14d   :  { %v315_v54 = vadd.f32 %v313_v53, %v308_v52 }
 0x14f   :  { %v316_v55 = vmax.f32 %v315_v54, 0.0 }
 0x151   :  { %v335_v56 = vpack.c.bf16 %v316_v55, %v316_v55 }
 0x153   :  { %588 = vmatmul.mubr.bf16.vlgmr.msra.gmra.mrb[0].mxu1 %v335_v56 }
 0x226   :  { %v418_v57 = vpop.f32.mrb[0].mxu1 }
 0x227   :  { %v424_v58 = vrot.slane %v418_v57, 4  ;;  %v431_v59 = vmul.f32 %v418_v57, %v418_v57  ;;  %v589_v60 = vpop.f32.mrb[1].mxu1 }
 0x228   :  { %v421_v61 = vpop.f32.mrb[2].mxu1 }
 0x229   :  { %v425_v62 = vadd.f32 %v424_v58, %v418_v57  ;;  %v432_v63 = vrot.slane %v431_v59, 4  ;;  %v590_v0 = vpop.f32.mrb[3].mxu1 }
 0x22b   :  { %v426_v1 = vrot.slane %v425_v62, 2  ;;  %v433_v2 = vadd.f32 %v432_v63, %v431_v59 }
 0x22d   :  { %v427_v3 = vadd.f32 %v426_v1, %v425_v62  ;;  %v434_v4 = vrot.slane %v433_v2, 2 }
 0x22f   :  { %v428_v5 = vrot.slane %v427_v3, 1  ;;  %v435_v6 = vadd.f32 %v434_v4, %v433_v2 }
 0x231   :  { %v429_v7 = vadd.f32 %v428_v5, %v427_v3  ;;  %v436_v8 = vrot.slane %v435_v6, 1 }
 0x233   :  { %v437_v9 = vadd.f32 %v436_v8, %v435_v6  ;;  %v430_v10 = vmul.f32 0.125, %v429_v7 }
 0x235   :  { %v438_v11 = vmul.f32 0.125, %v437_v9  ;;  %v439_v12 = vmul.f32 %v430_v10, %v430_v10 }
 0x237   :  { %v440_v13 = vsub.f32 %v438_v11, %v439_v12 }
 0x239   :  { %v441_v14 = vmax.f32 %v440_v13, 0.0 }
 0x23b   :  { %v442_v15 = vadd.f32 1e-05, %v441_v14 }
 0x23d   :  { %630 = vrsqrt.f32 %v442_v15 }
 0x247   :  { %v631_v17 = vpop.eup %630 }
 0x248   :  { %v444_v18 = vmul.f32 %v631_v17, %v333_v16 }
 0x24a   :  { %v445_v20 = vmul.f32 %v444_v18, %v430_v10  ;;  %v451_v21 = vrot.slane %v444_v18, %v305_v45 }
 0x24c   :  { %v446_v22 = vsub.f32 %v334_v19, %v445_v20  ;;  %v453_v23 = vmul.f32 %v451_v21, %v418_v57 }
 0x24e   :  { %v458_v24 = vrot.slane %v446_v22, %v305_v45 }
 0x250   :  { %v460_v25 = vadd.f32 %v458_v24, %v453_v23 }
 0x252   :  { %v461_v26 = vmax.f32 %v460_v25, 0.0 }
 0x254   :  { %462 = vst [vmem:[#allocation8] sm:$0xff] %v461_v26 }
 0x255   :  { %667 = shalt.err (!%p664_p2)
}
 0x256   :  { %s668_s23 = scalar_lea.hbm %s849_s11, 128 }
 0x257   :  { %p669_p3 = scmp.ne.s32.totalorder %s849_s11, %s668_s23  ;;  %p672_p4 = scmp.lt.u32.totalorder %s668_s23, %s849_s11 }
 0x259   :  { %p674_p5 = pnand %p672_p4, %p669_p3 }
 0x25b   :  { %677 = shalt.err (!%p674_p5)
}
 0x25c   :  { %472 = dma.vmem_to_hbm [thread:$0]  %s470_s3, 128, %s849_s11, [#allocation9]  }
 0x25d   :  { %692 = dma.done.wait [#allocation9], 128  }
 0x25e   :  { %693 = vsyncadd [#allocation9], 4294967168 }
 0x25f   :  { %476 = vsyncpa [#allocation9], 1 }
 0x260   :  { %477 = vsyncmov [#allocation4] }
 0x263   :  { %s478_s26 = vpop.sfrf %477 }
 0x264   :  { %p538_p6 = scmp.ne.s32.totalorder %s478_s26, 0 }
 0x266   :  { %482 = shalt.err (%p538_p6)  }
 0x267   :  { %484 = vsyncmov [#allocation4 + $0x1] }
 0x26a   :  { %s485_s27 = vpop.sfrf %484 }
 0x26b   :  { %p539_p7 = scmp.ne.s32.totalorder %s485_s27, 0 }
 0x26d   :  { %489 = shalt.err (%p539_p7)  }

</bundles_post_ra>
